<compile_context>
chip_gen: v7x
topology: tpu7x:2x2x1
jax: 0.10.0
libtpu: 0.0.40
codegen_flags: <defaults>
</compile_context>

<pallas_src>
import functools

import jax
import jax.numpy as jnp
from jax.experimental import pallas as pl
from jax.experimental.pallas import tpu as pltpu


# ------------------------------ Pallas kernel -------------------------------


def _deconv_block_kernel(x_ref, w_ref, b_ref, o_ref, *, Hq, Wq, Cin, Th, Tw,
                         Cout, s2, inv_hw, apply_norm, eps, mm_dtype):
    # x_ref: (1, H_pad, W_pad, Cin)   padded NHWC input, one batch element
    # w_ref: (Th*Tw*Cin, s2*Cout)     sub-pixel conv weights, all phases at once
    # b_ref: (1, s2*Cout)             bias tiled over the s*s phases
    # o_ref: (1, Hq*Wq, s2*Cout)      phase-major output (pixel-shuffled by wrapper)

    # Build the im2col patch once (Th*Tw small static taps), then ONE matmul.
    taps = []
    for th in range(Th):
        for tw in range(Tw):
            taps.append(
                x_ref[0, th:th + Hq, tw:tw + Wq, :].reshape(Hq * Wq, Cin))
    patch = jnp.concatenate(taps, axis=1)                    # (Hq*Wq, Th*Tw*Cin)

    acc = jnp.dot(patch.astype(mm_dtype), w_ref[...].astype(mm_dtype),
                  preferred_element_type=jnp.float32)        # (Hq*Wq, s2*Cout)

    if apply_norm:
        # NOTE: the ConvTranspose2d bias is intentionally NOT added here: a
        # per-channel constant offset is cancelled exactly by the mean
        # subtraction of InstanceNorm.
        #
        # One-pass stats (sum / sum-of-squares).  Columns are ordered
        # (phase, channel); a channel's statistics pool its s*s phase groups.
        csum = jnp.sum(acc, axis=0, keepdims=True)            # (1, s2*Cout)
        csq = jnp.sum(acc * acc, axis=0, keepdims=True)       # (1, s2*Cout)
        s_o = csum[:, 0:Cout]
        q_o = csq[:, 0:Cout]
        for p in range(1, s2):
            s_o = s_o + csum[:, p * Cout:(p + 1) * Cout]
            q_o = q_o + csq[:, p * Cout:(p + 1) * Cout]
        mean = s_o * inv_hw                                    # (1, Cout)
        var = q_o * inv_hw - mean * mean
        inv = jax.lax.rsqrt(var + eps)
        mean_c = jnp.concatenate([mean] * s2, axis=1)          # (1, s2*Cout)
        inv_c = jnp.concatenate([inv] * s2, axis=1)
        acc = (acc - mean_c) * inv_c
    else:
        acc = acc + b_ref[...].astype(jnp.float32)

    # TODO(synk): select_act_func is not provided by the reference -> ReLU used.
    acc = jnp.maximum(acc, 0.0)
    o_ref[0] = acc.astype(o_ref.dtype)


# --------------------------------- wrapper ----------------------------------


def _phase_params(K, pad, s):
    """Sub-pixel decomposition parameters along one spatial axis.

    For output phase r (output index = q*s + r), the contributing flipped-kernel
    taps are k' = base[r] + j*s (j = 0..taps[r]-1), reading input row q + off[r] + j.
    """
    base, taps, off = [], [], []
    for r in range(s):
        b = (pad - r) % s
        base.append(b)
        taps.append((K - b + s - 1) // s if b < K else 0)
        off.append(-((pad - r) // s))
    have = [r for r in range(s) if taps[r] > 0]
    emin = min(off[r] for r in have)
    T = max(taps[r] + off[r] for r in have) - emin
    return base, taps, off, emin, T


def deconv_block_forward(x_top, x_old, weight, bias, *, stride, padding,
                         out_hw, is_skip=True, is_norm=True, dilation=1,
                         groups=1, matmul_dtype=None):
    """Forward pass of DeconvBlock.

    x_top, x_old : (N, Cin, H, W)  NCHW, like PyTorch
    weight       : (Cin, Cout, KH, KW)  ConvTranspose2d weight layout
    bias         : (Cout,)
    out_hw       : target (Hout, Wout) -- plays the role of `shape` in forward()
    matmul_dtype : operand dtype for the MXU matmul (pass jnp.bfloat16 on
                   v6e/v7x for 2x MXU throughput; accumulation stays f32).
    """
    # TODO(synk): dilation > 1 and groups > 1 are not implemented.
    assert dilation == 1 and groups == 1
    N, Cin, H, W = x_top.shape
    Cin_w, Cout, KH, KW = weight.shape
    assert Cin == Cin_w
    s = stride
    Hout, Wout = out_hw

    # Validate the implied output_padding.
    op_h = Hout - ((H - 1) * s - 2 * padding + (KH - 1) + 1)
    op_w = Wout - ((W - 1) * s - 2 * padding + (KW - 1) + 1)
    assert 0 <= op_h < s and 0 <= op_w < s, "incompatible target shape"
    # TODO(synk): phases of unequal length (Hout % stride != 0) not implemented.
    assert Hout % s == 0 and Wout % s == 0

    pad_t = KH - 1 - padding
    pad_l = KW - 1 - padding
    assert pad_t >= 0 and pad_l >= 0

    Hq, Wq = Hout // s, Wout // s
    bh, Jh, eh, emin_h, Th = _phase_params(KH, pad_t, s)
    bw, Jw, ew, emin_w, Tw = _phase_params(KW, pad_l, s)

    # ---- glue (one fused XLA pass): skip-add + NCHW->NHWC + small pad ----
    x = x_top + x_old if is_skip else x_top
    x_nhwc = jnp.transpose(x, (0, 2, 3, 1))                 # (N, H, W, Cin)
    Lh, Lw = -emin_h, -emin_w
    H_pad, W_pad = Hq + Th - 1, Wq + Tw - 1
    Ht, Wt = min(H, H_pad - Lh), min(W, W_pad - Lw)
    x_pad = jnp.zeros((N, H_pad, W_pad, Cin), x.dtype)
    x_pad = x_pad.at[:, Lh:Lh + Ht, Lw:Lw + Wt, :].set(x_nhwc[:, :Ht, :Wt, :])

    # ---- sub-pixel weights: (Th, Tw, Cin, s*s*Cout), zero-padded taps ----
    SSC = s * s * Cout
    Wf = jnp.transpose(weight[:, :, ::-1, ::-1], (2, 3, 0, 1))  # (KH,KW,Cin,Cout)
    Wc = jnp.zeros((Th, Tw, Cin, SSC), weight.dtype)
    for rh in range(s):
        if Jh[rh] == 0:
            continue
        for rw in range(s):
            if Jw[rw] == 0:
                continue
            col = (rh * s + rw) * Cout
            for jh in range(Jh[rh]):
                th = jh + eh[rh] - emin_h
                for jw in range(Jw[rw]):
                    tw = jw + ew[rw] - emin_w
                    Wc = Wc.at[th, tw, :, col:col + Cout].set(
                        Wf[bh[rh] + jh * s, bw[rw] + jw * s])
    Wcf = Wc.reshape(Th * Tw * Cin, SSC)
    b_k = jnp.tile(bias.reshape(1, Cout), (1, s * s)).astype(jnp.float32)

    mm_dtype = matmul_dtype if matmul_dtype is not None else x.dtype
    kernel = functools.partial(
        _deconv_block_kernel, Hq=Hq, Wq=Wq, Cin=Cin, Th=Th, Tw=Tw, Cout=Cout,
        s2=s * s, inv_hw=1.0 / float(Hout * Wout), apply_norm=is_norm,
        eps=1e-5, mm_dtype=mm_dtype)

    z = pl.pallas_call(
        kernel,
        out_shape=jax.ShapeDtypeStruct((N, Hq * Wq, SSC), x.dtype),
        grid=(N,),
        in_specs=[
            pl.BlockSpec((1, H_pad, W_pad, Cin), lambda n: (n, 0, 0, 0)),
            pl.BlockSpec((Th * Tw * Cin, SSC), lambda n: (0, 0)),
            pl.BlockSpec((1, SSC), lambda n: (0, 0)),
        ],
        out_specs=pl.BlockSpec((1, Hq * Wq, SSC), lambda n: (n, 0, 0)),
        compiler_params=pltpu.CompilerParams(
            dimension_semantics=("parallel",),
            vmem_limit_bytes=32 * 1024 * 1024),
    )(x_pad, Wcf, b_k)

    # Pixel shuffle (depth-to-space) fused with the NHWC->NCHW conversion in a
    # single XLA transpose: z[n, qh*Wq+qw, (rh*s+rw)*Cout+o] -> y[n, o, qh*s+rh, qw*s+rw].
    z = z.reshape(N, Hq, Wq, s, s, Cout)
    y = jnp.transpose(z, (0, 5, 1, 3, 2, 4)).reshape(N, Cout, Hout, Wout)
    return y


# -------------------------------- reference ----------------------------------


def _reference_forward(x_top, x_old, weight, bias, *, stride, padding, out_hw,
                       is_skip=True, is_norm=True):
    N, Cin, H, W = x_top.shape
    _, Cout, KH, KW = weight.shape
    Hout, Wout = out_hw
    op_h = Hout - ((H - 1) * stride - 2 * padding + (KH - 1) + 1)
    op_w = Wout - ((W - 1) * stride - 2 * padding + (KW - 1) + 1)

    x = x_top + x_old if is_skip else x_top
    w_oihw = jnp.transpose(weight[:, :, ::-1, ::-1], (1, 0, 2, 3))  # (Cout,Cin,KH,KW)
    y = jax.lax.conv_general_dilated(
        x.astype(jnp.float32), w_oihw.astype(jnp.float32),
        window_strides=(1, 1),
        padding=[(KH - 1 - padding, KH - 1 - padding + op_h),
                 (KW - 1 - padding, KW - 1 - padding + op_w)],
        lhs_dilation=(stride, stride),
        dimension_numbers=("NCHW", "OIHW", "NCHW"),
    )
    y = y + bias[None, :, None, None]
    if is_norm:
        mean = y.mean(axis=(2, 3), keepdims=True)
        var = ((y - mean) ** 2).mean(axis=(2, 3), keepdims=True)
        y = (y - mean) * jax.lax.rsqrt(var + 1e-5)
    return jnp.maximum(y, 0.0)


# ----------------------------------- main -------------------------------------


if __name__ == "__main__":
    key = jax.random.PRNGKey(0)
    k1, k2, k3, k4 = jax.random.split(key, 4)

    N, Cin, H, W = 2, 4, 8, 8
    Cout, KH, KW = 8, 3, 3
    stride, padding = 2, 1
    out_hw = (16, 16)  # the `shape` argument of forward()

    x_top = jax.random.normal(k1, (N, Cin, H, W), jnp.float32)
    x_old = jax.random.normal(k2, (N, Cin, H, W), jnp.float32)
    weight = 0.2 * jax.random.normal(k3, (Cin, Cout, KH, KW), jnp.float32)
    bias = 0.1 * jax.random.normal(k4, (Cout,), jnp.float32)

    ok = True
    for is_skip, is_norm in [(True, True), (False, False)]:
        out = deconv_block_forward(
            x_top, x_old, weight, bias,
            stride=stride, padding=padding, out_hw=out_hw,
            is_skip=is_skip, is_norm=is_norm,
        )
        out = jax.block_until_ready(out)
        assert out.shape == (N, Cout, out_hw[0], out_hw[1]), out.shape

        ref = _reference_forward(
            x_top, x_old, weight, bias,
            stride=stride, padding=padding, out_hw=out_hw,
            is_skip=is_skip, is_norm=is_norm,
        )
        ref = jax.block_until_ready(ref)

        if not jnp.allclose(out, ref, rtol=1e-3, atol=1e-3):
            ok = False

    if not ok:
        raise AssertionError("Pallas DeconvBlock does not match reference")

    print("KERNEL_OK")
</pallas_src>

<mosaic_0001>
module attributes {stable_mosaic.version = 11 : i64} {
  func.func @_deconv_block_kernel(%arg0: i32, %arg1: memref<1x9x9x4xf32, #tpu.memory_space<vmem>>, %arg2: memref<16x32xf32, #tpu.memory_space<vmem>>, %arg3: memref<1x32xf32, #tpu.memory_space<vmem>>, %arg4: memref<1x64x32xf32, #tpu.memory_space<vmem>>) attributes {dimension_semantics = [#tpu.dimension_semantics<parallel>], iteration_bounds = array<i64: 2>, scalar_prefetch = 0 : i64, scratch_operands = 0 : i64, tpu.core_type = #tpu.core_type<tc>, window_params = [{transform_indices = @transform_0, window_bounds = array<i64: 1, 9, 9, 4>}, {pipeline_mode = #tpu.pipeline_mode<synchronous>, transform_indices = @transform_1, window_bounds = array<i64: 16, 32>}, {pipeline_mode = #tpu.pipeline_mode<synchronous>, transform_indices = @transform_2, window_bounds = array<i64: 1, 32>}, {transform_indices = @transform_3, window_bounds = array<i64: 1, 64, 32>}]} {
    %c0 = arith.constant 0 : index
    %c0_0 = arith.constant 0 : index
    %c0_1 = arith.constant 0 : index
    %c0_2 = arith.constant 0 : index
    %0 = vector.load %arg1[%c0, %c0_0, %c0_1, %c0_2] : memref<1x9x9x4xf32, #tpu.memory_space<vmem>>, vector<1x8x8x4xf32>
    %1 = vector.shape_cast %0 : vector<1x8x8x4xf32> to vector<8x8x4xf32>
    %2 = vector.shape_cast %1 : vector<8x8x4xf32> to vector<64x4xf32>
    %c0_3 = arith.constant 0 : index
    %c0_4 = arith.constant 0 : index
    %c1 = arith.constant 1 : index
    %c0_5 = arith.constant 0 : index
    %3 = vector.load %arg1[%c0_3, %c0_4, %c1, %c0_5] : memref<1x9x9x4xf32, #tpu.memory_space<vmem>>, vector<1x8x8x4xf32>
    %4 = vector.shape_cast %3 : vector<1x8x8x4xf32> to vector<8x8x4xf32>
    %5 = vector.shape_cast %4 : vector<8x8x4xf32> to vector<64x4xf32>
    %c0_6 = arith.constant 0 : index
    %c1_7 = arith.constant 1 : index
    %c0_8 = arith.constant 0 : index
    %c0_9 = arith.constant 0 : index
    %6 = vector.load %arg1[%c0_6, %c1_7, %c0_8, %c0_9] : memref<1x9x9x4xf32, #tpu.memory_space<vmem>>, vector<1x8x8x4xf32>
    %7 = vector.shape_cast %6 : vector<1x8x8x4xf32> to vector<8x8x4xf32>
    %8 = vector.shape_cast %7 : vector<8x8x4xf32> to vector<64x4xf32>
    %c0_10 = arith.constant 0 : index
    %c1_11 = arith.constant 1 : index
    %c1_12 = arith.constant 1 : index
    %c0_13 = arith.constant 0 : index
    %9 = vector.load %arg1[%c0_10, %c1_11, %c1_12, %c0_13] : memref<1x9x9x4xf32, #tpu.memory_space<vmem>>, vector<1x8x8x4xf32>
    %10 = vector.shape_cast %9 : vector<1x8x8x4xf32> to vector<8x8x4xf32>
    %11 = vector.shape_cast %10 : vector<8x8x4xf32> to vector<64x4xf32>
    %12 = tpu.concatenate %2, %5, %8, %11 in 1 : vector<64x4xf32>, vector<64x4xf32>, vector<64x4xf32>, vector<64x4xf32> -> vector<64x16xf32>
    %c0_14 = arith.constant 0 : index
    %c0_15 = arith.constant 0 : index
    %13 = vector.load %arg2[%c0_14, %c0_15] : memref<16x32xf32, #tpu.memory_space<vmem>>, vector<16x32xf32>
    %cst = arith.constant dense<0.000000e+00> : vector<64x32xf32>
    %14 = tpu.matmul %12, %13, %cst {dimension_numbers = #tpu.dot_dimension_numbers<[1], [0], [0], [1], [0, 0, 1, 1], [], []>} : vector<64x16xf32>, vector<16x32xf32>, vector<64x32xf32> -> vector<64x32xf32>
    %cst_16 = arith.constant dense<0.000000e+00> : vector<32xf32>
    %15 = vector.multi_reduction <add>, %14, %cst_16 [0] : vector<64x32xf32> to vector<32xf32>
    %16 = vector.shape_cast %15 : vector<32xf32> to vector<1x32xf32>
    %17 = arith.mulf %14, %14 : vector<64x32xf32>
    %cst_17 = arith.constant dense<0.000000e+00> : vector<32xf32>
    %18 = vector.multi_reduction <add>, %17, %cst_17 [0] : vector<64x32xf32> to vector<32xf32>
    %19 = vector.shape_cast %18 : vector<32xf32> to vector<1x32xf32>
    %20 = vector.extract_strided_slice %16 {offsets = [0, 0], sizes = [1, 8], strides = [1, 1]} : vector<1x32xf32> to vector<1x8xf32>
    %21 = vector.extract_strided_slice %19 {offsets = [0, 0], sizes = [1, 8], strides = [1, 1]} : vector<1x32xf32> to vector<1x8xf32>
    %22 = vector.extract_strided_slice %16 {offsets = [0, 8], sizes = [1, 8], strides = [1, 1]} : vector<1x32xf32> to vector<1x8xf32>
    %23 = arith.addf %20, %22 : vector<1x8xf32>
    %24 = vector.extract_strided_slice %19 {offsets = [0, 8], sizes = [1, 8], strides = [1, 1]} : vector<1x32xf32> to vector<1x8xf32>
    %25 = arith.addf %21, %24 : vector<1x8xf32>
    %26 = vector.extract_strided_slice %16 {offsets = [0, 16], sizes = [1, 8], strides = [1, 1]} : vector<1x32xf32> to vector<1x8xf32>
    %27 = arith.addf %23, %26 : vector<1x8xf32>
    %28 = vector.extract_strided_slice %19 {offsets = [0, 16], sizes = [1, 8], strides = [1, 1]} : vector<1x32xf32> to vector<1x8xf32>
    %29 = arith.addf %25, %28 : vector<1x8xf32>
    %30 = vector.extract_strided_slice %16 {offsets = [0, 24], sizes = [1, 8], strides = [1, 1]} : vector<1x32xf32> to vector<1x8xf32>
    %31 = arith.addf %27, %30 : vector<1x8xf32>
    %32 = vector.extract_strided_slice %19 {offsets = [0, 24], sizes = [1, 8], strides = [1, 1]} : vector<1x32xf32> to vector<1x8xf32>
    %33 = arith.addf %29, %32 : vector<1x8xf32>
    %cst_18 = arith.constant 3.906250e-03 : f32
    %34 = vector.broadcast %cst_18 : f32 to vector<1x8xf32>
    %35 = arith.mulf %31, %34 : vector<1x8xf32>
    %cst_19 = arith.constant 3.906250e-03 : f32
    %36 = vector.broadcast %cst_19 : f32 to vector<1x8xf32>
    %37 = arith.mulf %33, %36 : vector<1x8xf32>
    %38 = arith.mulf %35, %35 : vector<1x8xf32>
    %39 = arith.subf %37, %38 : vector<1x8xf32>
    %cst_20 = arith.constant 9.99999974E-6 : f32
    %40 = vector.broadcast %cst_20 : f32 to vector<1x8xf32>
    %41 = arith.addf %39, %40 : vector<1x8xf32>
    %42 = math.rsqrt %41 : vector<1x8xf32>
    %43 = tpu.concatenate %35, %35, %35, %35 in 1 : vector<1x8xf32>, vector<1x8xf32>, vector<1x8xf32>, vector<1x8xf32> -> vector<1x32xf32>
    %44 = tpu.concatenate %42, %42, %42, %42 in 1 : vector<1x8xf32>, vector<1x8xf32>, vector<1x8xf32>, vector<1x8xf32> -> vector<1x32xf32>
    %45 = vector.broadcast %43 : vector<1x32xf32> to vector<64x32xf32>
    %46 = arith.subf %14, %45 : vector<64x32xf32>
    %47 = vector.broadcast %44 : vector<1x32xf32> to vector<64x32xf32>
    %48 = arith.mulf %46, %47 : vector<64x32xf32>
    %cst_21 = arith.constant 0.000000e+00 : f32
    %49 = vector.broadcast %cst_21 : f32 to vector<64x32xf32>
    %50 = arith.maximumf %48, %49 : vector<64x32xf32>
    %c0_22 = arith.constant 0 : index
    %c0_23 = arith.constant 0 : index
    %c0_24 = arith.constant 0 : index
    %51 = vector.load %arg4[%c0_22, %c0_23, %c0_24] : memref<1x64x32xf32, #tpu.memory_space<vmem>>, vector<1x64x32xf32>
    %52 = vector.shape_cast %51 : vector<1x64x32xf32> to vector<64x32xf32>
    %53 = vector.shape_cast %50 : vector<64x32xf32> to vector<1x64x32xf32>
    tpu.vector_store %arg4[%c0_22, %c0_23, %c0_24], %53 {strides = array<i32>} : memref<1x64x32xf32, #tpu.memory_space<vmem>>, vector<1x64x32xf32>,
    return
  }
  func.func @transform_0(%arg0: i32) -> (i32, i32, i32, i32) {
    %c0_i32 = arith.constant 0 : i32
    %c0_i32_0 = arith.constant 0 : i32
    %c0_i32_1 = arith.constant 0 : i32
    %c0_i32_2 = arith.constant 0 : i32
    return %arg0, %c0_i32, %c0_i32_0, %c0_i32_1 : i32, i32, i32, i32
  }
  func.func @transform_1(%arg0: i32) -> (i32, i32) {
    %c0_i32 = arith.constant 0 : i32
    %c0_i32_0 = arith.constant 0 : i32
    %c0_i32_1 = arith.constant 0 : i32
    return %c0_i32, %c0_i32_0 : i32, i32
  }
  func.func @transform_2(%arg0: i32) -> (i32, i32) {
    %c0_i32 = arith.constant 0 : i32
    %c0_i32_0 = arith.constant 0 : i32
    %c0_i32_1 = arith.constant 0 : i32
    return %c0_i32, %c0_i32_0 : i32, i32
  }
  func.func @transform_3(%arg0: i32) -> (i32, i32, i32) {
    %c0_i32 = arith.constant 0 : i32
    %c0_i32_0 = arith.constant 0 : i32
    %c0_i32_1 = arith.constant 0 : i32
    return %arg0, %c0_i32, %c0_i32_0 : i32, i32, i32
  }
}

</mosaic_0001>

<bundles_post_ra>
// kernel: tpu_custom_call.1
= control target key start
LH: loop header
LB: loop body
LE: loop exit
PB: predicated region body
PF: predicated region fallthrough
CT: control target
= control target key end

     0   :  { %s786_s12 = smov 0   ;;  %s979_s0 = inlined_call_operand.vmem [shape: f32[2,9,9,4], index: 0, kind: input, shape index: {}]   ;;  %s980_s1 = inlined_call_operand.vmem [shape: f32[16,32], index: 1, kind: input, shape index: {}]   ;;  %s981_s2 = inlined_call_operand.vmem [shape: f32[1,32], index: 2, kind: input, shape index: {}]   ;;  %s982_s3 = inlined_call_operand.vmem [shape: f32[2,64,32], index: 3, kind: output, shape index: {}]  }
   0x1 LB: > { %s664_s13 = sadd.s32 4294967295, %s756_s12   ;;  %p668_p0 = scmp.ge.s32.totalorder %s756_s12, 1  ;;  %s756_s12 = sphi %s786_s12, %s13_s12  }
   0x2   : > { %p137_p1 = scmp.lt.s32.totalorder %s756_s12, 3 }
   0x4   : > { %p138_p2 = pnand %p668_p0, %p137_p1 }
   0x5   : > { %p161_p3 = scmp.lt.s32.totalorder (!%p138_p2), %s664_s13, 1  ;;  %v327_v0 = vld [vmem:[%s980_s1] sm:$0xff] (!%p138_p2)  ;;  %v328_v1 = vld [vmem:[%s980_s1 + $0x8] sm:$0xff] (!%p138_p2)  ;;  %s758_s21 = smov (!%p138_p2), 8   ;;  %vm300_vm0 = vcmask (!%p138_p2), 31744   ;;  %vm309_vm1 = vcmask (!%p138_p2), 64512  }
   0x6   : > { %141 = sbr.rel (%p138_p2) target bundleno = 683 (0x2ab), region = 32  ;;  %v725_v2 = vpack.c.bf16 (!%p138_p2), %v328_v1, %v327_v0  ;;  %s759_s22 = smov (!%p138_p2), 4   ;;  %vm318_vm2 = vcmask (!%p138_p2), 97280   ;;  %vm329_vm3 = vcmask (!%p138_p2), 130048   ;;  %vm459_vm4 = vcmask (!%p138_p2), 261120  }
   0x7   : > { %s760_s23 = smov (!%p138_p2), 12   ;;  %s761_s24 = smov (!%p138_p2), 120   ;;  %vm554_vm5 = vcmask (!%p138_p2), 195584  }
   0x8   : > { %726 = vmatprep.subr.bf16.mxu0 (!%p138_p2), %v725_v2  ;;  %729 = vmatprep.subr.bf16.mxu1 (!%p138_p2), %v725_v2  ;;  %s762_s25 = smov (!%p138_p2), 112   ;;  %s763_s26 = smov (!%p138_p2), 104  }
   0x9   : > { %728 = vmatpush3.bf16.msra.mxu0 (!%p138_p2), %v725_v2  ;;  %730 = vmatpush3.bf16.msra.mxu1 (!%p138_p2), %v725_v2  ;;  %s764_s27 = smov (!%p138_p2), 16   ;;  %s765_s28 = smov (!%p138_p2), 24  }
   0xd   : > { %s984_s13 = smov (!%p161_p3, %s664_s13), 1 }
   0xe   : > { %s731_s17 = smul.u32 144, %s984_s13  ;;  %s698_s29 = sshll.u32 %s984_s13, 6 }
   0xf   : > { %s170_s5 = scalar_lea.vmem %s982_s3, %s698_s29 }
  0x10   : > { %s806_s20 = scalar_lea.vmem %s979_s0, %s731_s17 }
  0x11   : > { %v672_v3 = vld [vmem:[%s806_s20 + $0x10] sm:$0xff]  ;;  %v179_v4 = vld [vmem:[%s806_s20 + $0x1] sm:$0xff] }
  0x12   : > { %244 = vrot.lane.b32.xlu1 %v672_v3, %s758_s21  ;;  %212 = vrot.lane.b32.xlu0 %v179_v4, %s759_s22  ;;  %v813_v5 = vld [vmem:[%s806_s20 + $0x20] sm:$0xff]  ;;  %v180_v6 = vld [vmem:[%s806_s20 + $0x11] sm:$0xff] }
  0x13   : > { %v681_v7 = vld [vmem:[%s806_s20 + $0x21] sm:$0xff]  ;;  %v182_v8 = vld [vmem:[%s806_s20 + $0x31] sm:$0xff] }
  0x14   : > { %v826_v9 = vld [vmem:[%s806_s20 + $0x40] sm:$0xff]  ;;  %v674_v10 = vld [vmem:[%s806_s20 + $0x30] sm:$0xff] }
  0x15   : > { %v683_v11 = vld [vmem:[%s806_s20 + $0x41] sm:$0xff]  ;;  %v184_v12 = vld [vmem:[%s806_s20 + $0x51] sm:$0xff] }
  0x16   : > { %246 = vrot.lane.b32.xlu1 %v813_v5, %s758_s21  ;;  %214 = vrot.lane.b32.xlu0 %v180_v6, %s759_s22  ;;  %v839_v13 = vld [vmem:[%s806_s20 + $0x60] sm:$0xff]  ;;  %v676_v14 = vld [vmem:[%s806_s20 + $0x50] sm:$0xff] }
  0x17   : > { %v685_v15 = vld [vmem:[%s806_s20 + $0x61] sm:$0xff]  ;;  %v186_v16 = vld [vmem:[%s806_s20 + $0x71] sm:$0xff] }
  0x18   : > { %v679_v17 = vld [vmem:[%s806_s20 + $0x80] sm:$0xff]  ;;  %v678_v18 = vld [vmem:[%s806_s20 + $0x70] sm:$0xff] }
  0x19   : > { %v687_v19 = vld [vmem:[%s806_s20 + $0x81] sm:$0xff] }
  0x1a   : > { %278 = vrot.lane.b32.xlu1 %v681_v7, %s760_s23  ;;  %276 = vrot.lane.b32.xlu0 %v180_v6, %s760_s23  ;;  %v171_v22 = vld [vmem:[%s806_s20] sm:$0xff] }
  0x1e   : > { %218 = vrot.lane.b32.xlu1 %v182_v8, %s759_s22  ;;  %216 = vrot.lane.b32.xlu0 %v681_v7, %s759_s22 }
  0x22   : > { %250 = vrot.lane.b32.xlu1 %v826_v9, %s758_s21  ;;  %248 = vrot.lane.b32.xlu0 %v674_v10, %s758_s21 }
  0x26   : > { %282 = vrot.lane.b32.xlu1 %v683_v11, %s760_s23  ;;  %280 = vrot.lane.b32.xlu0 %v182_v8, %s760_s23 }
  0x2a   : > { %222 = vrot.lane.b32.xlu1 %v184_v12, %s759_s22  ;;  %220 = vrot.lane.b32.xlu0 %v683_v11, %s759_s22 }
  0x2e   : > { %254 = vrot.lane.b32.xlu1 %v839_v13, %s758_s21  ;;  %252 = vrot.lane.b32.xlu0 %v676_v14, %s758_s21 }
  0x32   : > { %286 = vrot.lane.b32.xlu1 %v685_v15, %s760_s23  ;;  %284 = vrot.lane.b32.xlu0 %v184_v12, %s760_s23 }
  0x36   : > { %226 = vrot.lane.b32.xlu1 %v186_v16, %s759_s22  ;;  %224 = vrot.lane.b32.xlu0 %v685_v15, %s759_s22 }
  0x3a   : > { %258 = vrot.lane.b32.xlu1 %v679_v17, %s758_s21  ;;  %256 = vrot.lane.b32.xlu0 %v678_v18, %s758_s21 }
  0x3e   : > { %290 = vrot.lane.b32.xlu1 %v687_v19, %s760_s23  ;;  %288 = vrot.lane.b32.xlu0 %v186_v16, %s760_s23 }
  0x84   : > { %v245_v20 = vpop.permute.xlu1 %244  ;;  %v213_v21 = vpop.permute.xlu0 %212 }
  0x85   : > { %v301_v25 = vsel %vm300_vm0, %v171_v22, %v213_v21 }
  0x86   : > { %v310_v30 = vsel %vm309_vm1, %v301_v25, %v245_v20 }
  0x88   : > { %v247_v23 = vpop.permute.xlu1 %246  ;;  %v215_v24 = vpop.permute.xlu0 %214 }
  0x89   : > { %v302_v26 = vsel %vm300_vm0, %v672_v3, %v215_v24 }
  0x8a   : > { %v311_v28 = vsel %vm309_vm1, %v302_v26, %v247_v23 }
  0x8c   : > { %v279_v27 = vpop.permute.xlu1 %278  ;;  %v277_v29 = vpop.permute.xlu0 %276 }
  0x8d   : > { %v320_v31 = vsel %vm318_vm2, %v311_v28, %v279_v27  ;;  %v319_v32 = vsel %vm318_vm2, %v310_v30, %v277_v29 }
  0x8e   : > { %713 = vmatprep.mubr.msk.f32.mxu0 %vm329_vm3, %v319_v32 }
  0x8f   : > { %714 = vmatmul.mubr.msk.f32.vlgmr.msra.gmra.mrb[0].mxu0 %vm329_vm3, %v320_v31 }
  0x90   : > { %v219_v33 = vpop.permute.xlu1 %218  ;;  %v217_v34 = vpop.permute.xlu0 %216 }
  0x91   : > { %v304_v37 = vsel %vm300_vm0, %v674_v10, %v219_v33  ;;  %v303_v38 = vsel %vm300_vm0, %v813_v5, %v217_v34 }
  0x94   : > { %v251_v35 = vpop.permute.xlu1 %250  ;;  %v249_v36 = vpop.permute.xlu0 %248 }
  0x95   : > { %v313_v39 = vsel %vm309_vm1, %v304_v37, %v251_v35  ;;  %v312_v40 = vsel %vm309_vm1, %v303_v38, %v249_v36 }
  0x98   : > { %v283_v41 = vpop.permute.xlu1 %282  ;;  %v281_v42 = vpop.permute.xlu0 %280 }
  0x99   : > { %v322_v43 = vsel %vm318_vm2, %v313_v39, %v283_v41  ;;  %v321_v44 = vsel %vm318_vm2, %v312_v40, %v281_v42 }
  0x9a   : > { %716 = vmatprep.mubr.msk.f32.mxu0 %vm329_vm3, %v321_v44 }
  0x9b   : > { %717 = vmatmul.mubr.msk.f32.gmra.mrb[2].mxu0 %vm329_vm3, %v322_v43 }
  0x9c   : > { %v223_v45 = vpop.permute.xlu1 %222  ;;  %v221_v46 = vpop.permute.xlu0 %220 }
  0x9d   : > { %v306_v49 = vsel %vm300_vm0, %v676_v14, %v223_v45  ;;  %v305_v50 = vsel %vm300_vm0, %v826_v9, %v221_v46 }
  0xa0   : > { %v255_v47 = vpop.permute.xlu1 %254  ;;  %v253_v48 = vpop.permute.xlu0 %252 }
  0xa1   : > { %v315_v51 = vsel %vm309_vm1, %v306_v49, %v255_v47  ;;  %v314_v52 = vsel %vm309_vm1, %v305_v50, %v253_v48 }
  0xa4   : > { %v287_v53 = vpop.permute.xlu1 %286  ;;  %v285_v54 = vpop.permute.xlu0 %284 }
  0xa5   : > { %v324_v55 = vsel %vm318_vm2, %v315_v51, %v287_v53  ;;  %v323_v56 = vsel %vm318_vm2, %v314_v52, %v285_v54 }
  0xa6   : > { %719 = vmatprep.mubr.msk.f32.mxu1 %vm329_vm3, %v323_v56 }
  0xa7   : > { %720 = vmatmul.mubr.msk.f32.vlgmr.msra.gmra.mrb[0].mxu1 %vm329_vm3, %v324_v55 }
  0xa8   : > { %v227_v57 = vpop.permute.xlu1 %226  ;;  %v225_v58 = vpop.permute.xlu0 %224 }
  0xa9   : > { %v308_v61 = vsel %vm300_vm0, %v678_v18, %v227_v57  ;;  %v307_v62 = vsel %vm300_vm0, %v839_v13, %v225_v58 }
  0xac   : > { %v259_v59 = vpop.permute.xlu1 %258  ;;  %v257_v60 = vpop.permute.xlu0 %256 }
  0xad   : > { %v317_v63 = vsel %vm309_vm1, %v308_v61, %v259_v59  ;;  %v316_v0 = vsel %vm309_vm1, %v307_v62, %v257_v60 }
  0xb0   : > { %v291_v1 = vpop.permute.xlu1 %290  ;;  %v289_v2 = vpop.permute.xlu0 %288 }
  0xb1   : > { %v326_v3 = vsel %vm318_vm2, %v317_v63, %v291_v1  ;;  %v325_v4 = vsel %vm318_vm2, %v316_v0, %v289_v2 }
  0xb2   : > { %722 = vmatprep.mubr.msk.f32.mxu1 %vm329_vm3, %v325_v4 }
  0xb3   : > { %723 = vmatmul.mubr.msk.f32.gmra.mrb[2].mxu1 %vm329_vm3, %v326_v3 }
 0x162   : > { %v894_v5 = vpop.f32.mrb[0].mxu0 }
 0x163   : > { %v461_v6 = vsel %vm459_vm4, %v894_v5, 0.0  ;;  %v482_v7 = vmul.f32 %v894_v5, %v894_v5  ;;  %v900_v8 = vpop.f32.mrb[1].mxu0 }
 0x164   : > { %v460_v9 = vsel %vm459_vm4, %v900_v8, 0.0  ;;  %v481_v10 = vmul.f32 %v900_v8, %v900_v8 }
 0x165   : > { %v490_v11 = vsel %vm459_vm4, %v482_v7, 0.0  ;;  %v462_v12 = vadd.f32 %v461_v6, %v460_v9 }
 0x166   : > { %v489_v13 = vsel %vm459_vm4, %v481_v10, 0.0 }
 0x167   : > { %v491_v14 = vadd.f32 %v490_v11, %v489_v13 }
 0x16e   : > { %v908_v15 = vpop.f32.mrb[2].mxu0 }
 0x16f   : > { %v910_v16 = vpop.f32.mrb[3].mxu0  ;;  %v484_v17 = vmul.f32 %v908_v15, %v908_v15  ;;  %v465_v21 = vsel %vm459_vm4, %v908_v15, 0.0 }
 0x170   : > { %v463_v18 = vsel %vm459_vm4, %v910_v16, 0.0  ;;  %v483_v19 = vmul.f32 %v910_v16, %v910_v16 }
 0x171   : > { %v464_v20 = vadd.f32 %v463_v18, %v462_v12  ;;  %v494_v25 = vsel %vm459_vm4, %v484_v17, 0.0 }
 0x172   : > { %v492_v22 = vsel %vm459_vm4, %v483_v19, 0.0 }
 0x173   : > { %v466_v23 = vadd.f32 %v465_v21, %v464_v20  ;;  %v493_v24 = vadd.f32 %v492_v22, %v491_v14  ;;  %v569_v22 = vlaneseq }
 0x175   : > { %v495_v26 = vadd.f32 %v494_v25, %v493_v24 }
 0x17a   : > { %v922_v27 = vpop.f32.mrb[0].mxu1 }
 0x17b   : > { %v924_v28 = vpop.f32.mrb[1].mxu1  ;;  %v486_v29 = vmul.f32 %v922_v27, %v922_v27  ;;  %v469_v33 = vsel %vm459_vm4, %v922_v27, 0.0 }
 0x17c   : > { %v467_v30 = vsel %vm459_vm4, %v924_v28, 0.0  ;;  %v485_v31 = vmul.f32 %v924_v28, %v924_v28 }
 0x17d   : > { %v468_v32 = vadd.f32 %v467_v30, %v466_v23  ;;  %v498_v37 = vsel %vm459_vm4, %v486_v29, 0.0  ;;  %v570_v23 = vshrl.u32 %v569_v22, 7 }
 0x17e   : > { %v496_v34 = vsel %vm459_vm4, %v485_v31, 0.0 }
 0x17f   : > { %v497_v35 = vadd.f32 %v496_v34, %v495_v26  ;;  %v470_v36 = vadd.f32 %v469_v33, %v468_v32  ;;  %v571_v30 = vsub.s32 0, %v570_v23 }
 0x181   : > { %v499_v38 = vadd.f32 %v498_v37, %v497_v35 }
 0x186   : > { %v936_v39 = vpop.f32.mrb[2].mxu1 }
 0x187   : > { %v938_v40 = vpop.f32.mrb[3].mxu1  ;;  %v488_v41 = vmul.f32 %v936_v39, %v936_v39  ;;  %v473_v45 = vsel %vm459_vm4, %v936_v39, 0.0 }
 0x188   : > { %v471_v42 = vsel %vm459_vm4, %v938_v40, 0.0  ;;  %v487_v43 = vmul.f32 %v938_v40, %v938_v40 }
 0x189   : > { %v472_v44 = vadd.f32 %v471_v42, %v470_v36  ;;  %v502_v49 = vsel %vm459_vm4, %v488_v41, 0.0 }
 0x18a   : > { %v500_v46 = vsel %vm459_vm4, %v487_v43, 0.0 }
 0x18b   : > { %v474_v47 = vadd.f32 %v473_v45, %v472_v44  ;;  %v501_v48 = vadd.f32 %v500_v46, %v499_v38 }
 0x18d   : > { %v475_v50 = vrot.slane %v474_v47, 4  ;;  %v503_v51 = vadd.f32 %v502_v49, %v501_v48 }
 0x18f   : > { %v476_v52 = vadd.f32 %v475_v50, %v474_v47  ;;  %v504_v53 = vrot.slane %v503_v51, 4 }
 0x191   : > { %v477_v54 = vrot.slane %v476_v52, 2  ;;  %v505_v55 = vadd.f32 %v504_v53, %v503_v51 }
 0x193   : > { %v478_v56 = vadd.f32 %v477_v54, %v476_v52  ;;  %v506_v57 = vrot.slane %v505_v55, 2 }
 0x195   : > { %v479_v58 = vrot.slane %v478_v56, 1  ;;  %v507_v59 = vadd.f32 %v506_v57, %v505_v55 }
 0x197   : > { %v480_v60 = vadd.f32 %v479_v58, %v478_v56  ;;  %v508_v61 = vrot.slane %v507_v59, 1 }
 0x199   : > { %511 = vrot.lane.b32.xlu0 %v480_v60, %s761_s24  ;;  %v509_v62 = vadd.f32 %v508_v61, %v507_v59 }
 0x19b   : > { %516 = vrot.lane.b32.xlu1 %v509_v62, %s761_s24 }
 0x19d   : > { %520 = vrot.lane.b32.xlu0 %v480_v60, %s762_s25 }
 0x19f   : > { %524 = vrot.lane.b32.xlu1 %v509_v62, %s762_s25 }
 0x1a1   : > { %528 = vrot.lane.b32.xlu0 %v480_v60, %s763_s26 }
 0x1a3   : > { %532 = vrot.lane.b32.xlu1 %v509_v62, %s763_s26 }
 0x20b   : > { %v512_v63 = vpop.permute.xlu0 %511 }
 0x20c   : > { %v514_v2 = vadd.f32 %v512_v63, %v480_v60 }
 0x20d   : > { %v517_v0 = vpop.permute.xlu1 %516 }
 0x20e   : > { %v519_v4 = vadd.f32 %v517_v0, %v509_v62 }
 0x20f   : > { %v521_v1 = vpop.permute.xlu0 %520 }
 0x210   : > { %v523_v6 = vadd.f32 %v521_v1, %v514_v2 }
 0x211   : > { %v525_v3 = vpop.permute.xlu1 %524 }
 0x212   : > { %v527_v9 = vadd.f32 %v525_v3, %v519_v4 }
 0x213   : > { %v529_v7 = vpop.permute.xlu0 %528 }
 0x214   : > { %v531_v10 = vadd.f32 %v529_v7, %v523_v6 }
 0x215   : > { %v533_v11 = vpop.permute.xlu1 %532 }
 0x216   : > { %v536_v12 = vmul.f32 0.00390625, %v531_v10  ;;  %v535_v13 = vadd.f32 %v533_v11, %v527_v9 }
 0x218   : > { %v537_v14 = vmul.f32 0.00390625, %v535_v13  ;;  %v538_v17 = vmul.f32 %v536_v12, %v536_v12  ;;  %546 = vrot.lane.b32.xlu1 %v536_v12, %s764_s27  ;;  %543 = vrot.lane.b32.xlu0 %v536_v12, %s758_s21 }
 0x21a   : > { %v539_v18 = vsub.f32 %v537_v14, %v538_v17 }
 0x21c   : > { %v540_v19 = vadd.f32 1e-05, %v539_v18  ;;  %549 = vrot.lane.b32.xlu0 %v536_v12, %s765_s28 }
 0x21e   : > { %748 = vrsqrt.f32 %v540_v19 }
 0x228   : > { %v749_v20 = vpop.eup %748 }
 0x229   : > { %560 = vrot.lane.b32.xlu0 %v749_v20, %s764_s27  ;;  %557 = vrot.lane.b32.xlu1 %v749_v20, %s758_s21 }
 0x22d   : > { %563 = vrot.lane.b32.xlu1 %v749_v20, %s765_s28 }
 0x28a   : > { %v544_v21 = vpop.permute.xlu0 %543  ;;  %v547_v24 = vpop.permute.xlu1 %546 }
 0x28b   : > { %v552_v25 = vsel %vm309_vm1, %v536_v12, %v544_v21 }
 0x28c   : > { %v553_v29 = vsel %vm329_vm3, %v552_v25, %v547_v24 }
 0x28e   : > { %v550_v26 = vpop.permute.xlu0 %549 }
 0x28f   : > { %v555_v31 = vsel %vm554_vm5, %v553_v29, %v550_v26 }
 0x290   : > { %v572_v33 = vrot.slane %v555_v31, %v571_v30 }
 0x292   : > { %v573_v38 = vsub.f32 %v900_v8, %v572_v33  ;;  %v574_v42 = vsub.f32 %v894_v5, %v572_v33  ;;  %v575_v43 = vsub.f32 %v910_v16, %v572_v33  ;;  %v576_v44 = vsub.f32 %v908_v15, %v572_v33 }
 0x293   : > { %v577_v46 = vsub.f32 %v924_v28, %v572_v33  ;;  %v578_v47 = vsub.f32 %v922_v27, %v572_v33  ;;  %v579_v48 = vsub.f32 %v938_v40, %v572_v33  ;;  %v580_v49 = vsub.f32 %v936_v39, %v572_v33 }
 0x29b   : > { %v558_v32 = vpop.permute.xlu1 %557  ;;  %v561_v34 = vpop.permute.xlu0 %560 }
 0x29c   : > { %v566_v35 = vsel %vm309_vm1, %v749_v20, %v558_v32 }
 0x29d   : > { %v567_v36 = vsel %vm329_vm3, %v566_v35, %v561_v34 }
 0x29f   : > { %v564_v37 = vpop.permute.xlu1 %563 }
 0x2a0   : > { %v568_v41 = vsel %vm554_vm5, %v567_v36, %v564_v37 }
 0x2a1   : > { %v584_v45 = vrot.slane %v568_v41, %v571_v30 }
 0x2a3   : > { %v585_v50 = vmul.f32 %v584_v45, %v573_v38  ;;  %v586_v51 = vmul.f32 %v584_v45, %v574_v42  ;;  %v587_v8 = vmul.f32 %v584_v45, %v575_v43  ;;  %v588_v52 = vmul.f32 %v584_v45, %v576_v44 }
 0x2a4   : > { %v589_v5 = vmul.f32 %v584_v45, %v577_v46  ;;  %v590_v15 = vmul.f32 %v584_v45, %v578_v47  ;;  %v591_v16 = vmul.f32 %v584_v45, %v579_v48  ;;  %v592_v53 = vmul.f32 %v584_v45, %v580_v49 }
 0x2a5   : > { %v593_v54 = vmax.f32 %v585_v50, 0.0  ;;  %v594_v28 = vmax.f32 %v586_v51, 0.0  ;;  %v595_v55 = vmax.f32 %v587_v8, 0.0  ;;  %v596_v27 = vmax.f32 %v588_v52, 0.0 }
 0x2a6   : > { %v597_v56 = vmax.f32 %v589_v5, 0.0  ;;  %v598_v40 = vmax.f32 %v590_v15, 0.0  ;;  %v599_v57 = vmax.f32 %v591_v16, 0.0  ;;  %v600_v39 = vmax.f32 %v592_v53, 0.0 }
 0x2a7   : > { %601 = vst.msk [vmem:[%s170_s5] sm:$0xff] %vm459_vm4, %v593_v54  ;;  %602 = vst.msk [vmem:[%s170_s5 + $0x8] sm:$0xff] %vm459_vm4, %v594_v28 }
 0x2a8   : > { %603 = vst.msk [vmem:[%s170_s5 + $0x10] sm:$0xff] %vm459_vm4, %v595_v55  ;;  %604 = vst.msk [vmem:[%s170_s5 + $0x18] sm:$0xff] %vm459_vm4, %v596_v27 }
 0x2a9   : > { %605 = vst.msk [vmem:[%s170_s5 + $0x20] sm:$0xff] %vm459_vm4, %v597_v56  ;;  %606 = vst.msk [vmem:[%s170_s5 + $0x28] sm:$0xff] %vm459_vm4, %v598_v40 }
 0x2aa   : > { %607 = vst.msk [vmem:[%s170_s5 + $0x30] sm:$0xff] %vm459_vm4, %v599_v57  ;;  %608 = vst.msk [vmem:[%s170_s5 + $0x38] sm:$0xff] %vm459_vm4, %v600_v39 }
 0x2ab PF: > { %s13_s12 = sadd.s32 1, %s756_s12  }
 0x2ac   : > { %p10_p4 = scmp.ge.s32.totalorder %s13_s12, 4  }
 0x2ae   :  { %12 = sbr.rel (!%p10_p4) target bundleno = 1 (0x1), region = 63 }

</bundles_post_ra>
